<compile_context>
chip_gen: v5e
topology: v5e:2x2
jax: 0.10.0
libtpu: 0.0.40
codegen_flags: <defaults>
</compile_context>

<pallas_src>
import functools

import jax
import jax.numpy as jnp
from jax.experimental import pallas as pl
from jax.experimental.pallas import tpu as pltpu


# ----------------------------- Pallas kernel --------------------------------
def transformer_kernel(
    x_ref,        # (B, T, D)  f32
    alpha_ref,    # (1, 1)     f32  (SMEM)
    gamma_ref,    # (1, D)     f32
    beta_ref,     # (1, D)     f32
    wq_ref,       # (D, D)     bf16 (1/sqrt(dh) pre-folded)
    wk_ref,       # (D, D)     bf16
    wv_ref,       # (D, D)     bf16
    wo_ref,       # (D, D)     bf16
    bo_ref,       # (1, D)     f32
    w1_ref,       # (D, 4D)    bf16
    b1_ref,       # (1, 4D)    f32
    w2_ref,       # (4D, D)    bf16
    b2_ref,       # (1, D)     f32
    o_ref,        # (B, T, D)  f32
    ctx_ref,      # (B*T, D)   f32 VMEM scratch (per-head context scatter)
    *,
    num_heads: int,
):
    B, T, D = x_ref.shape
    H = num_heads
    dh = D // H
    N = B * T
    G = B * H

    # flatten batch*seq -> rows (free: T is a sublane multiple)
    x = x_ref[...].reshape(N, D)                      # (N, D) f32
    alpha = alpha_ref[0, 0]                           # scalar from SMEM
    gamma = gamma_ref[...]                            # (1, D)
    beta = beta_ref[...]                              # (1, D)

    def dyt(v):                                       # DynamicTanh (f32)
        return gamma * jnp.tanh(v * alpha) + beta

    def gelu(v):                                      # tanh-approx GELU (f32)
        c = jnp.sqrt(jnp.float32(2.0 / jnp.pi))
        return 0.5 * v * (1.0 + jnp.tanh(c * (v + 0.044715 * v * v * v)))

    # ---------------- block 1: DyT -> causal MHA -> residual ----------------
    h1 = dyt(x).astype(jnp.bfloat16)                  # bf16 MXU inputs

    q = jnp.dot(h1, wq_ref[...], preferred_element_type=jnp.float32)  # (N, D)
    k = jnp.dot(h1, wk_ref[...], preferred_element_type=jnp.float32)
    v = jnp.dot(h1, wv_ref[...], preferred_element_type=jnp.float32)

    def split_heads(m):
        # (N, D) -> (B*H, T, dh) via static slices; heads become a leading
        # batch axis so both attention matmuls are single batched contractions.
        return jnp.stack(
            [m[b * T:(b + 1) * T, h * dh:(h + 1) * dh]
             for b in range(B) for h in range(H)],
            axis=0,
        )

    q_g = split_heads(q).astype(jnp.bfloat16)         # (G, T, dh)
    k_g = split_heads(k).astype(jnp.bfloat16)
    v_g = split_heads(v).astype(jnp.bfloat16)

    # causal additive mask, built once for the whole (T, T) tile
    row = jax.lax.broadcasted_iota(jnp.int32, (T, T), 0)
    col = jax.lax.broadcasted_iota(jnp.int32, (T, T), 1)
    neg = jnp.where(col > row, jnp.float32(-1e30), jnp.float32(0.0))

    # scores: one batched contraction over all (batch, head) pairs
    scores = jnp.einsum("gqd,gkd->gqk", q_g, k_g,
                        preferred_element_type=jnp.float32)            # (G,T,T)
    scores = scores + neg[None]

    m = jnp.max(scores, axis=-1, keepdims=True)
    p = jnp.exp(scores - m)
    l = jnp.sum(p, axis=-1, keepdims=True)
    attn = (p * pl.reciprocal(l, approx=True)).astype(jnp.bfloat16)    # EUP div

    ctx_g = jnp.einsum("gqk,gkd->gqd", attn, v_g,
                       preferred_element_type=jnp.float32)             # (G,T,dh)

    # scatter head outputs into a preallocated (N, D) scratch at static
    # offsets (replaces jnp.concatenate + its relayout)
    for g in range(G):
        b, h = divmod(g, H)
        ctx_ref[b * T:(b + 1) * T, h * dh:(h + 1) * dh] = ctx_g[g]

    ctx = ctx_ref[...].astype(jnp.bfloat16)
    attn_out = jnp.dot(ctx, wo_ref[...],
                       preferred_element_type=jnp.float32) + bo_ref[...]
    x1 = attn_out + x                                                   # f32

    # ---------------- block 2: DyT -> FFN(GELU) -> residual -----------------
    h2 = dyt(x1).astype(jnp.bfloat16)
    ff = jnp.dot(h2, w1_ref[...], preferred_element_type=jnp.float32) + b1_ref[...]
    ff = gelu(ff).astype(jnp.bfloat16)
    ff = jnp.dot(ff, w2_ref[...], preferred_element_type=jnp.float32) + b2_ref[...]

    o_ref[...] = (ff + x1).reshape(B, T, D).astype(o_ref.dtype)


# ------------------------------- wrapper -------------------------------------
def transformer_block(x, params, num_heads):
    B, T, D = x.shape
    Dff = params["w1"].shape[1]
    dh = D // num_heads
    N = B * T

    # bf16 weights (halves DMA bytes + VMEM, enables bf16 MXU peak);
    # fold 1/sqrt(head_dim) into Wq so the (T,T) scores never get rescaled.
    cdt = jnp.bfloat16
    wq = (params["wq"] / jnp.sqrt(jnp.float32(dh))).astype(cdt)
    wk = params["wk"].astype(cdt)
    wv = params["wv"].astype(cdt)
    wo = params["wo"].astype(cdt)
    w1 = params["w1"].astype(cdt)
    w2 = params["w2"].astype(cdt)

    kernel = functools.partial(transformer_kernel, num_heads=num_heads)

    def full_block(shape):
        nd = len(shape)
        return pl.BlockSpec(shape, lambda i, _nd=nd: (0,) * _nd)

    in_specs = [
        full_block((B, T, D)),                                    # x
        pl.BlockSpec(memory_space=pltpu.MemorySpace.SMEM),        # alpha (scalar)
        full_block((1, D)),                                       # gamma
        full_block((1, D)),                                       # beta
        full_block((D, D)),                                       # Wq (scaled)
        full_block((D, D)),                                       # Wk
        full_block((D, D)),                                       # Wv
        full_block((D, D)),                                       # Wo
        full_block((1, D)),                                       # bo
        full_block((D, Dff)),                                     # W1
        full_block((1, Dff)),                                     # b1
        full_block((Dff, D)),                                     # W2
        full_block((1, D)),                                       # b2
    ]
    out_spec = full_block((B, T, D))

    grid_spec = pltpu.PrefetchScalarGridSpec(
        num_scalar_prefetch=0,
        grid=(1,),                                   # single step: whole problem
        in_specs=in_specs,
        out_specs=out_spec,
        scratch_shapes=[pltpu.VMEM((N, D), jnp.float32)],         # ctx scatter
    )

    flops = 8 * N * D * D + 4 * N * T * D + 4 * N * D * Dff
    transcendentals = 2 * N * D + N * Dff + B * num_heads * T * T
    bytes_accessed = (
        2 * N * D * 4                               # x in + out (f32)
        + (4 * D * D + 2 * D * Dff) * 2             # bf16 weights
        + (4 * D + 2 * Dff + 1) * 4                 # gamma/beta/biases/alpha
    )
    cost = pl.CostEstimate(flops=flops,
                           transcendentals=transcendentals,
                           bytes_accessed=bytes_accessed)

    return pl.pallas_call(
        kernel,
        out_shape=jax.ShapeDtypeStruct((B, T, D), x.dtype),
        grid_spec=grid_spec,
        compiler_params=pltpu.CompilerParams(
            dimension_semantics=("arbitrary",),
            vmem_limit_bytes=32 * 1024 * 1024,
        ),
        cost_estimate=cost,
    )(
        x,
        params["alpha"], params["gamma"], params["beta"],
        wq, wk, wv, wo, params["bo"],
        w1, params["b1"], w2, params["b2"],
    )


# ---------------------------- pure-JAX reference ------------------------------
def reference(x, p, num_heads):
    B, T, D = x.shape
    dh = D // num_heads

    def dyt(v):
        return p["gamma"][0] * jnp.tanh(v * p["alpha"][0, 0]) + p["beta"][0]

    def gelu(v):
        c = jnp.sqrt(jnp.float32(2.0 / jnp.pi))
        return 0.5 * v * (1.0 + jnp.tanh(c * (v + 0.044715 * v ** 3)))

    shortcut = x
    h = dyt(x)
    q = h @ p["wq"]
    k = h @ p["wk"]
    v = h @ p["wv"]
    qh = q.reshape(B, T, num_heads, dh).transpose(0, 2, 1, 3)
    kh = k.reshape(B, T, num_heads, dh).transpose(0, 2, 1, 3)
    vh = v.reshape(B, T, num_heads, dh).transpose(0, 2, 1, 3)
    scores = jnp.einsum("bhqd,bhkd->bhqk", qh, kh) / jnp.sqrt(jnp.float32(dh))
    mask = jnp.triu(jnp.ones((T, T), dtype=bool), k=1)
    scores = jnp.where(mask[None, None], -jnp.inf, scores)
    attn = jax.nn.softmax(scores, axis=-1)
    ctx = jnp.einsum("bhqk,bhkd->bhqd", attn, vh).transpose(0, 2, 1, 3).reshape(B, T, D)
    attn_out = ctx @ p["wo"] + p["bo"][0]
    x1 = attn_out + shortcut

    shortcut2 = x1
    h2 = dyt(x1)
    ff = gelu(h2 @ p["w1"] + p["b1"][0])
    ff = ff @ p["w2"] + p["b2"][0]
    return ff + shortcut2


# --------------------------------- main ---------------------------------------
if __name__ == "__main__":
    # small config: batch=2, context_length=8, embed_dim=32, n_heads=4
    B, T, D, H = 2, 8, 32, 4
    Dff = 4 * D

    key = jax.random.PRNGKey(0)
    keys = jax.random.split(key, 8)

    x = jax.random.normal(keys[0], (B, T, D), dtype=jnp.float32)

    scale = 0.02
    params = {
        # DynamicTanh params (per module __init__): alpha=0.5, gamma=1, beta=1
        "alpha": jnp.full((1, 1), 0.5, dtype=jnp.float32),
        "gamma": jnp.ones((1, D), dtype=jnp.float32),
        "beta": jnp.ones((1, D), dtype=jnp.float32),
        # CausalAttention (qkv_bias=False), out_proj with bias
        "wq": scale * jax.random.normal(keys[1], (D, D), dtype=jnp.float32),
        "wk": scale * jax.random.normal(keys[2], (D, D), dtype=jnp.float32),
        "wv": scale * jax.random.normal(keys[3], (D, D), dtype=jnp.float32),
        "wo": scale * jax.random.normal(keys[4], (D, D), dtype=jnp.float32),
        "bo": jnp.zeros((1, D), dtype=jnp.float32),
        # GPTFeedForward: D -> 4D -> GELU -> D
        "w1": scale * jax.random.normal(keys[5], (D, Dff), dtype=jnp.float32),
        "b1": jnp.zeros((1, Dff), dtype=jnp.float32),
        "w2": scale * jax.random.normal(keys[6], (Dff, D), dtype=jnp.float32),
        "b2": jnp.zeros((1, D), dtype=jnp.float32),
    }

    out = transformer_block(x, params, num_heads=H)
    out = jax.block_until_ready(out)

    ref = reference(x, params, num_heads=H)
    assert out.shape == (B, T, D)
    # bf16 MXU inputs + approx reciprocal => compare at bf16-appropriate tolerance
    err = jnp.max(jnp.abs(out - ref))
    assert jnp.allclose(out, ref, atol=1e-2, rtol=1e-2), f"max abs err {err}"

    print("KERNEL_OK")
</pallas_src>

<mosaic_0001>
module attributes {stable_mosaic.version = 11 : i64} {
  func.func @transformer_kernel(%arg0: i32, %arg1: memref<2x8x32xf32, #tpu.memory_space<vmem>>, %arg2: memref<1x1xf32, #tpu.memory_space<smem>>, %arg3: memref<1x32xf32, #tpu.memory_space<vmem>>, %arg4: memref<1x32xf32, #tpu.memory_space<vmem>>, %arg5: memref<32x32xbf16, #tpu.memory_space<vmem>>, %arg6: memref<32x32xbf16, #tpu.memory_space<vmem>>, %arg7: memref<32x32xbf16, #tpu.memory_space<vmem>>, %arg8: memref<32x32xbf16, #tpu.memory_space<vmem>>, %arg9: memref<1x32xf32, #tpu.memory_space<vmem>>, %arg10: memref<32x128xbf16, #tpu.memory_space<vmem>>, %arg11: memref<1x128xf32, #tpu.memory_space<vmem>>, %arg12: memref<128x32xbf16, #tpu.memory_space<vmem>>, %arg13: memref<1x32xf32, #tpu.memory_space<vmem>>, %arg14: memref<2x8x32xf32, #tpu.memory_space<vmem>>, %arg15: memref<16x32xf32, #tpu.memory_space<vmem>>) attributes {dimension_semantics = [#tpu.dimension_semantics<arbitrary>], iteration_bounds = array<i64: 1>, scalar_prefetch = 0 : i64, scratch_operands = 1 : i64, tpu.core_type = #tpu.core_type<tc>, window_params = [{pipeline_mode = #tpu.pipeline_mode<synchronous>, transform_indices = @transform_0, window_bounds = array<i64: 2, 8, 32>}, {transform_indices = @transform_1, window_bounds = array<i64: 1, 1>}, {pipeline_mode = #tpu.pipeline_mode<synchronous>, transform_indices = @transform_2, window_bounds = array<i64: 1, 32>}, {pipeline_mode = #tpu.pipeline_mode<synchronous>, transform_indices = @transform_3, window_bounds = array<i64: 1, 32>}, {pipeline_mode = #tpu.pipeline_mode<synchronous>, transform_indices = @transform_4, window_bounds = array<i64: 32, 32>}, {pipeline_mode = #tpu.pipeline_mode<synchronous>, transform_indices = @transform_5, window_bounds = array<i64: 32, 32>}, {pipeline_mode = #tpu.pipeline_mode<synchronous>, transform_indices = @transform_6, window_bounds = array<i64: 32, 32>}, {pipeline_mode = #tpu.pipeline_mode<synchronous>, transform_indices = @transform_7, window_bounds = array<i64: 32, 32>}, {pipeline_mode = #tpu.pipeline_mode<synchronous>, transform_indices = @transform_8, window_bounds = array<i64: 1, 32>}, {pipeline_mode = #tpu.pipeline_mode<synchronous>, transform_indices = @transform_9, window_bounds = array<i64: 32, 128>}, {pipeline_mode = #tpu.pipeline_mode<synchronous>, transform_indices = @transform_10, window_bounds = array<i64: 1, 128>}, {pipeline_mode = #tpu.pipeline_mode<synchronous>, transform_indices = @transform_11, window_bounds = array<i64: 128, 32>}, {pipeline_mode = #tpu.pipeline_mode<synchronous>, transform_indices = @transform_12, window_bounds = array<i64: 1, 32>}, {pipeline_mode = #tpu.pipeline_mode<synchronous>, transform_indices = @transform_13, window_bounds = array<i64: 2, 8, 32>}]} {
    %c0 = arith.constant 0 : index
    %c0_0 = arith.constant 0 : index
    %c0_1 = arith.constant 0 : index
    %0 = vector.load %arg1[%c0, %c0_0, %c0_1] : memref<2x8x32xf32, #tpu.memory_space<vmem>>, vector<2x8x32xf32>
    %1 = vector.shape_cast %0 : vector<2x8x32xf32> to vector<16x32xf32>
    %c0_2 = arith.constant 0 : index
    %c0_3 = arith.constant 0 : index
    %2 = memref.load %arg2[%c0_2, %c0_3] : memref<1x1xf32, #tpu.memory_space<smem>>
    %c0_4 = arith.constant 0 : index
    %c0_5 = arith.constant 0 : index
    %3 = vector.load %arg3[%c0_4, %c0_5] : memref<1x32xf32, #tpu.memory_space<vmem>>, vector<1x32xf32>
    %c0_6 = arith.constant 0 : index
    %c0_7 = arith.constant 0 : index
    %4 = vector.load %arg4[%c0_6, %c0_7] : memref<1x32xf32, #tpu.memory_space<vmem>>, vector<1x32xf32>
    %5 = vector.broadcast %2 : f32 to vector<16x32xf32>
    %6 = arith.mulf %1, %5 : vector<16x32xf32>
    %7 = math.tanh %6 : vector<16x32xf32>
    %8 = vector.broadcast %3 : vector<1x32xf32> to vector<16x32xf32>
    %9 = arith.mulf %8, %7 : vector<16x32xf32>
    %10 = vector.broadcast %4 : vector<1x32xf32> to vector<16x32xf32>
    %11 = arith.addf %9, %10 : vector<16x32xf32>
    %12 = arith.truncf %11 : vector<16x32xf32> to vector<16x32xbf16>
    %c0_8 = arith.constant 0 : index
    %c0_9 = arith.constant 0 : index
    %13 = vector.load %arg5[%c0_8, %c0_9] : memref<32x32xbf16, #tpu.memory_space<vmem>>, vector<32x32xbf16>
    %cst = arith.constant dense<0.000000e+00> : vector<16x32xf32>
    %14 = tpu.matmul %12, %13, %cst {dimension_numbers = #tpu.dot_dimension_numbers<[1], [0], [0], [1], [0, 0, 1, 1], [], []>} : vector<16x32xbf16>, vector<32x32xbf16>, vector<16x32xf32> -> vector<16x32xf32>
    %c0_10 = arith.constant 0 : index
    %c0_11 = arith.constant 0 : index
    %15 = vector.load %arg6[%c0_10, %c0_11] : memref<32x32xbf16, #tpu.memory_space<vmem>>, vector<32x32xbf16>
    %cst_12 = arith.constant dense<0.000000e+00> : vector<16x32xf32>
    %16 = tpu.matmul %12, %15, %cst_12 {dimension_numbers = #tpu.dot_dimension_numbers<[1], [0], [0], [1], [0, 0, 1, 1], [], []>} : vector<16x32xbf16>, vector<32x32xbf16>, vector<16x32xf32> -> vector<16x32xf32>
    %c0_13 = arith.constant 0 : index
    %c0_14 = arith.constant 0 : index
    %17 = vector.load %arg7[%c0_13, %c0_14] : memref<32x32xbf16, #tpu.memory_space<vmem>>, vector<32x32xbf16>
    %cst_15 = arith.constant dense<0.000000e+00> : vector<16x32xf32>
    %18 = tpu.matmul %12, %17, %cst_15 {dimension_numbers = #tpu.dot_dimension_numbers<[1], [0], [0], [1], [0, 0, 1, 1], [], []>} : vector<16x32xbf16>, vector<32x32xbf16>, vector<16x32xf32> -> vector<16x32xf32>
    %19 = vector.extract_strided_slice %14 {offsets = [0, 0], sizes = [8, 8], strides = [1, 1]} : vector<16x32xf32> to vector<8x8xf32>
    %20 = vector.extract_strided_slice %14 {offsets = [0, 8], sizes = [8, 8], strides = [1, 1]} : vector<16x32xf32> to vector<8x8xf32>
    %21 = vector.extract_strided_slice %14 {offsets = [0, 16], sizes = [8, 8], strides = [1, 1]} : vector<16x32xf32> to vector<8x8xf32>
    %22 = vector.extract_strided_slice %14 {offsets = [0, 24], sizes = [8, 8], strides = [1, 1]} : vector<16x32xf32> to vector<8x8xf32>
    %23 = vector.extract_strided_slice %14 {offsets = [8, 0], sizes = [8, 8], strides = [1, 1]} : vector<16x32xf32> to vector<8x8xf32>
    %24 = vector.extract_strided_slice %14 {offsets = [8, 8], sizes = [8, 8], strides = [1, 1]} : vector<16x32xf32> to vector<8x8xf32>
    %25 = vector.extract_strided_slice %14 {offsets = [8, 16], sizes = [8, 8], strides = [1, 1]} : vector<16x32xf32> to vector<8x8xf32>
    %26 = vector.extract_strided_slice %14 {offsets = [8, 24], sizes = [8, 8], strides = [1, 1]} : vector<16x32xf32> to vector<8x8xf32>
    %27 = vector.shape_cast %19 : vector<8x8xf32> to vector<1x8x8xf32>
    %28 = vector.shape_cast %20 : vector<8x8xf32> to vector<1x8x8xf32>
    %29 = vector.shape_cast %21 : vector<8x8xf32> to vector<1x8x8xf32>
    %30 = vector.shape_cast %22 : vector<8x8xf32> to vector<1x8x8xf32>
    %31 = vector.shape_cast %23 : vector<8x8xf32> to vector<1x8x8xf32>
    %32 = vector.shape_cast %24 : vector<8x8xf32> to vector<1x8x8xf32>
    %33 = vector.shape_cast %25 : vector<8x8xf32> to vector<1x8x8xf32>
    %34 = vector.shape_cast %26 : vector<8x8xf32> to vector<1x8x8xf32>
    %35 = tpu.concatenate %27, %28, %29, %30, %31, %32, %33, %34 in 0 : vector<1x8x8xf32>, vector<1x8x8xf32>, vector<1x8x8xf32>, vector<1x8x8xf32>, vector<1x8x8xf32>, vector<1x8x8xf32>, vector<1x8x8xf32>, vector<1x8x8xf32> -> vector<8x8x8xf32>
    %36 = arith.truncf %35 : vector<8x8x8xf32> to vector<8x8x8xbf16>
    %37 = vector.extract_strided_slice %16 {offsets = [0, 0], sizes = [8, 8], strides = [1, 1]} : vector<16x32xf32> to vector<8x8xf32>
    %38 = vector.extract_strided_slice %16 {offsets = [0, 8], sizes = [8, 8], strides = [1, 1]} : vector<16x32xf32> to vector<8x8xf32>
    %39 = vector.extract_strided_slice %16 {offsets = [0, 16], sizes = [8, 8], strides = [1, 1]} : vector<16x32xf32> to vector<8x8xf32>
    %40 = vector.extract_strided_slice %16 {offsets = [0, 24], sizes = [8, 8], strides = [1, 1]} : vector<16x32xf32> to vector<8x8xf32>
    %41 = vector.extract_strided_slice %16 {offsets = [8, 0], sizes = [8, 8], strides = [1, 1]} : vector<16x32xf32> to vector<8x8xf32>
    %42 = vector.extract_strided_slice %16 {offsets = [8, 8], sizes = [8, 8], strides = [1, 1]} : vector<16x32xf32> to vector<8x8xf32>
    %43 = vector.extract_strided_slice %16 {offsets = [8, 16], sizes = [8, 8], strides = [1, 1]} : vector<16x32xf32> to vector<8x8xf32>
    %44 = vector.extract_strided_slice %16 {offsets = [8, 24], sizes = [8, 8], strides = [1, 1]} : vector<16x32xf32> to vector<8x8xf32>
    %45 = vector.shape_cast %37 : vector<8x8xf32> to vector<1x8x8xf32>
    %46 = vector.shape_cast %38 : vector<8x8xf32> to vector<1x8x8xf32>
    %47 = vector.shape_cast %39 : vector<8x8xf32> to vector<1x8x8xf32>
    %48 = vector.shape_cast %40 : vector<8x8xf32> to vector<1x8x8xf32>
    %49 = vector.shape_cast %41 : vector<8x8xf32> to vector<1x8x8xf32>
    %50 = vector.shape_cast %42 : vector<8x8xf32> to vector<1x8x8xf32>
    %51 = vector.shape_cast %43 : vector<8x8xf32> to vector<1x8x8xf32>
    %52 = vector.shape_cast %44 : vector<8x8xf32> to vector<1x8x8xf32>
    %53 = tpu.concatenate %45, %46, %47, %48, %49, %50, %51, %52 in 0 : vector<1x8x8xf32>, vector<1x8x8xf32>, vector<1x8x8xf32>, vector<1x8x8xf32>, vector<1x8x8xf32>, vector<1x8x8xf32>, vector<1x8x8xf32>, vector<1x8x8xf32> -> vector<8x8x8xf32>
    %54 = arith.truncf %53 : vector<8x8x8xf32> to vector<8x8x8xbf16>
    %55 = vector.extract_strided_slice %18 {offsets = [0, 0], sizes = [8, 8], strides = [1, 1]} : vector<16x32xf32> to vector<8x8xf32>
    %56 = vector.extract_strided_slice %18 {offsets = [0, 8], sizes = [8, 8], strides = [1, 1]} : vector<16x32xf32> to vector<8x8xf32>
    %57 = vector.extract_strided_slice %18 {offsets = [0, 16], sizes = [8, 8], strides = [1, 1]} : vector<16x32xf32> to vector<8x8xf32>
    %58 = vector.extract_strided_slice %18 {offsets = [0, 24], sizes = [8, 8], strides = [1, 1]} : vector<16x32xf32> to vector<8x8xf32>
    %59 = vector.extract_strided_slice %18 {offsets = [8, 0], sizes = [8, 8], strides = [1, 1]} : vector<16x32xf32> to vector<8x8xf32>
    %60 = vector.extract_strided_slice %18 {offsets = [8, 8], sizes = [8, 8], strides = [1, 1]} : vector<16x32xf32> to vector<8x8xf32>
    %61 = vector.extract_strided_slice %18 {offsets = [8, 16], sizes = [8, 8], strides = [1, 1]} : vector<16x32xf32> to vector<8x8xf32>
    %62 = vector.extract_strided_slice %18 {offsets = [8, 24], sizes = [8, 8], strides = [1, 1]} : vector<16x32xf32> to vector<8x8xf32>
    %63 = vector.shape_cast %55 : vector<8x8xf32> to vector<1x8x8xf32>
    %64 = vector.shape_cast %56 : vector<8x8xf32> to vector<1x8x8xf32>
    %65 = vector.shape_cast %57 : vector<8x8xf32> to vector<1x8x8xf32>
    %66 = vector.shape_cast %58 : vector<8x8xf32> to vector<1x8x8xf32>
    %67 = vector.shape_cast %59 : vector<8x8xf32> to vector<1x8x8xf32>
    %68 = vector.shape_cast %60 : vector<8x8xf32> to vector<1x8x8xf32>
    %69 = vector.shape_cast %61 : vector<8x8xf32> to vector<1x8x8xf32>
    %70 = vector.shape_cast %62 : vector<8x8xf32> to vector<1x8x8xf32>
    %71 = tpu.concatenate %63, %64, %65, %66, %67, %68, %69, %70 in 0 : vector<1x8x8xf32>, vector<1x8x8xf32>, vector<1x8x8xf32>, vector<1x8x8xf32>, vector<1x8x8xf32>, vector<1x8x8xf32>, vector<1x8x8xf32>, vector<1x8x8xf32> -> vector<8x8x8xf32>
    %72 = arith.truncf %71 : vector<8x8x8xf32> to vector<8x8x8xbf16>
    %73 = tpu.iota {dimensions = array<i32: 0>} : vector<8x8xi32>
    %74 = tpu.iota {dimensions = array<i32: 1>} : vector<8x8xi32>
    %75 = arith.cmpi sgt, %74, %73 : vector<8x8xi32>
    %cst_16 = arith.constant -1.000000e+30 : f32
    %cst_17 = arith.constant 0.000000e+00 : f32
    %76 = vector.broadcast %cst_16 : f32 to vector<8x8xf32>
    %77 = vector.broadcast %cst_17 : f32 to vector<8x8xf32>
    %78 = arith.select %75, %76, %77 : vector<8x8xi1>, vector<8x8xf32>
    "tpu.trace_start"() <{level = 10 : i32, message = "gqd,gkd->gqk"}> : () -> ()
    %cst_18 = arith.constant dense<0.000000e+00> : vector<8x8x8xf32>
    %79 = tpu.matmul %36, %54, %cst_18 {dimension_numbers = #tpu.dot_dimension_numbers<[2], [2], [1], [1], [0, 0, 0, 1, 1, 1], [0], [0]>} : vector<8x8x8xbf16>, vector<8x8x8xbf16>, vector<8x8x8xf32> -> vector<8x8x8xf32>
    "tpu.trace_stop"() : () -> ()
    %80 = vector.shape_cast %78 : vector<8x8xf32> to vector<1x8x8xf32>
    %81 = vector.broadcast %80 : vector<1x8x8xf32> to vector<8x8x8xf32>
    %82 = arith.addf %79, %81 : vector<8x8x8xf32>
    %cst_19 = arith.constant dense<0xFF800000> : vector<8x8xf32>
    %83 = vector.multi_reduction <maximumf>, %82, %cst_19 [2] : vector<8x8x8xf32> to vector<8x8xf32>
    %84 = vector.shape_cast %83 : vector<8x8xf32> to vector<8x8x1xf32>
    %85 = vector.broadcast %84 : vector<8x8x1xf32> to vector<8x8x8xf32>
    %86 = arith.subf %82, %85 : vector<8x8x8xf32>
    %87 = math.exp %86 : vector<8x8x8xf32>
    %cst_20 = arith.constant dense<0.000000e+00> : vector<8x8xf32>
    %88 = vector.multi_reduction <add>, %87, %cst_20 [2] : vector<8x8x8xf32> to vector<8x8xf32>
    %89 = vector.shape_cast %88 : vector<8x8xf32> to vector<8x8x1xf32>
    %90 = tpu.reciprocal %89 {approx = true} : vector<8x8x1xf32> -> vector<8x8x1xf32>
    %91 = vector.broadcast %90 : vector<8x8x1xf32> to vector<8x8x8xf32>
    %92 = arith.mulf %87, %91 : vector<8x8x8xf32>
    %93 = arith.truncf %92 : vector<8x8x8xf32> to vector<8x8x8xbf16>
    "tpu.trace_start"() <{level = 10 : i32, message = "gqk,gkd->gqd"}> : () -> ()
    %cst_21 = arith.constant dense<0.000000e+00> : vector<8x8x8xf32>
    %94 = tpu.matmul %93, %72, %cst_21 {dimension_numbers = #tpu.dot_dimension_numbers<[2], [1], [1], [2], [0, 0, 0, 1, 1, 2], [0], [0]>} : vector<8x8x8xbf16>, vector<8x8x8xbf16>, vector<8x8x8xf32> -> vector<8x8x8xf32>
    "tpu.trace_stop"() : () -> ()
    %95 = vector.extract_strided_slice %94 {offsets = [0, 0, 0], sizes = [1, 8, 8], strides = [1, 1, 1]} : vector<8x8x8xf32> to vector<1x8x8xf32>
    %96 = vector.shape_cast %95 : vector<1x8x8xf32> to vector<8x8xf32>
    %c0_22 = arith.constant 0 : index
    %c0_23 = arith.constant 0 : index
    %97 = vector.load %arg15[%c0_22, %c0_23] : memref<16x32xf32, #tpu.memory_space<vmem>>, vector<8x8xf32>
    tpu.vector_store %arg15[%c0_22, %c0_23], %96 {strides = array<i32>} : memref<16x32xf32, #tpu.memory_space<vmem>>, vector<8x8xf32>,
    %98 = vector.extract_strided_slice %94 {offsets = [1, 0, 0], sizes = [1, 8, 8], strides = [1, 1, 1]} : vector<8x8x8xf32> to vector<1x8x8xf32>
    %99 = vector.shape_cast %98 : vector<1x8x8xf32> to vector<8x8xf32>
    %c0_24 = arith.constant 0 : index
    %c8 = arith.constant 8 : index
    %100 = vector.load %arg15[%c0_24, %c8] : memref<16x32xf32, #tpu.memory_space<vmem>>, vector<8x8xf32>
    tpu.vector_store %arg15[%c0_24, %c8], %99 {strides = array<i32>} : memref<16x32xf32, #tpu.memory_space<vmem>>, vector<8x8xf32>,
    %101 = vector.extract_strided_slice %94 {offsets = [2, 0, 0], sizes = [1, 8, 8], strides = [1, 1, 1]} : vector<8x8x8xf32> to vector<1x8x8xf32>
    %102 = vector.shape_cast %101 : vector<1x8x8xf32> to vector<8x8xf32>
    %c0_25 = arith.constant 0 : index
    %c16 = arith.constant 16 : index
    %103 = vector.load %arg15[%c0_25, %c16] : memref<16x32xf32, #tpu.memory_space<vmem>>, vector<8x8xf32>
    tpu.vector_store %arg15[%c0_25, %c16], %102 {strides = array<i32>} : memref<16x32xf32, #tpu.memory_space<vmem>>, vector<8x8xf32>,
    %104 = vector.extract_strided_slice %94 {offsets = [3, 0, 0], sizes = [1, 8, 8], strides = [1, 1, 1]} : vector<8x8x8xf32> to vector<1x8x8xf32>
    %105 = vector.shape_cast %104 : vector<1x8x8xf32> to vector<8x8xf32>
    %c0_26 = arith.constant 0 : index
    %c24 = arith.constant 24 : index
    %106 = vector.load %arg15[%c0_26, %c24] : memref<16x32xf32, #tpu.memory_space<vmem>>, vector<8x8xf32>
    tpu.vector_store %arg15[%c0_26, %c24], %105 {strides = array<i32>} : memref<16x32xf32, #tpu.memory_space<vmem>>, vector<8x8xf32>,
    %107 = vector.extract_strided_slice %94 {offsets = [4, 0, 0], sizes = [1, 8, 8], strides = [1, 1, 1]} : vector<8x8x8xf32> to vector<1x8x8xf32>
    %108 = vector.shape_cast %107 : vector<1x8x8xf32> to vector<8x8xf32>
    %c8_27 = arith.constant 8 : index
    %c0_28 = arith.constant 0 : index
    %109 = vector.load %arg15[%c8_27, %c0_28] : memref<16x32xf32, #tpu.memory_space<vmem>>, vector<8x8xf32>
    tpu.vector_store %arg15[%c8_27, %c0_28], %108 {strides = array<i32>} : memref<16x32xf32, #tpu.memory_space<vmem>>, vector<8x8xf32>,
    %110 = vector.extract_strided_slice %94 {offsets = [5, 0, 0], sizes = [1, 8, 8], strides = [1, 1, 1]} : vector<8x8x8xf32> to vector<1x8x8xf32>
    %111 = vector.shape_cast %110 : vector<1x8x8xf32> to vector<8x8xf32>
    %c8_29 = arith.constant 8 : index
    %c8_30 = arith.constant 8 : index
    %112 = vector.load %arg15[%c8_29, %c8_30] : memref<16x32xf32, #tpu.memory_space<vmem>>, vector<8x8xf32>
    tpu.vector_store %arg15[%c8_29, %c8_30], %111 {strides = array<i32>} : memref<16x32xf32, #tpu.memory_space<vmem>>, vector<8x8xf32>,
    %113 = vector.extract_strided_slice %94 {offsets = [6, 0, 0], sizes = [1, 8, 8], strides = [1, 1, 1]} : vector<8x8x8xf32> to vector<1x8x8xf32>
    %114 = vector.shape_cast %113 : vector<1x8x8xf32> to vector<8x8xf32>
    %c8_31 = arith.constant 8 : index
    %c16_32 = arith.constant 16 : index
    %115 = vector.load %arg15[%c8_31, %c16_32] : memref<16x32xf32, #tpu.memory_space<vmem>>, vector<8x8xf32>
    tpu.vector_store %arg15[%c8_31, %c16_32], %114 {strides = array<i32>} : memref<16x32xf32, #tpu.memory_space<vmem>>, vector<8x8xf32>,
    %116 = vector.extract_strided_slice %94 {offsets = [7, 0, 0], sizes = [1, 8, 8], strides = [1, 1, 1]} : vector<8x8x8xf32> to vector<1x8x8xf32>
    %117 = vector.shape_cast %116 : vector<1x8x8xf32> to vector<8x8xf32>
    %c8_33 = arith.constant 8 : index
    %c24_34 = arith.constant 24 : index
    %118 = vector.load %arg15[%c8_33, %c24_34] : memref<16x32xf32, #tpu.memory_space<vmem>>, vector<8x8xf32>
    tpu.vector_store %arg15[%c8_33, %c24_34], %117 {strides = array<i32>} : memref<16x32xf32, #tpu.memory_space<vmem>>, vector<8x8xf32>,
    %c0_35 = arith.constant 0 : index
    %c0_36 = arith.constant 0 : index
    %119 = vector.load %arg15[%c0_35, %c0_36] : memref<16x32xf32, #tpu.memory_space<vmem>>, vector<16x32xf32>
    %120 = arith.truncf %119 : vector<16x32xf32> to vector<16x32xbf16>
    %c0_37 = arith.constant 0 : index
    %c0_38 = arith.constant 0 : index
    %121 = vector.load %arg8[%c0_37, %c0_38] : memref<32x32xbf16, #tpu.memory_space<vmem>>, vector<32x32xbf16>
    %cst_39 = arith.constant dense<0.000000e+00> : vector<16x32xf32>
    %122 = tpu.matmul %120, %121, %cst_39 {dimension_numbers = #tpu.dot_dimension_numbers<[1], [0], [0], [1], [0, 0, 1, 1], [], []>} : vector<16x32xbf16>, vector<32x32xbf16>, vector<16x32xf32> -> vector<16x32xf32>
    %c0_40 = arith.constant 0 : index
    %c0_41 = arith.constant 0 : index
    %123 = vector.load %arg9[%c0_40, %c0_41] : memref<1x32xf32, #tpu.memory_space<vmem>>, vector<1x32xf32>
    %124 = vector.broadcast %123 : vector<1x32xf32> to vector<16x32xf32>
    %125 = arith.addf %122, %124 : vector<16x32xf32>
    %126 = arith.addf %125, %1 : vector<16x32xf32>
    %127 = vector.broadcast %2 : f32 to vector<16x32xf32>
    %128 = arith.mulf %126, %127 : vector<16x32xf32>
    %129 = math.tanh %128 : vector<16x32xf32>
    %130 = vector.broadcast %3 : vector<1x32xf32> to vector<16x32xf32>
    %131 = arith.mulf %130, %129 : vector<16x32xf32>
    %132 = vector.broadcast %4 : vector<1x32xf32> to vector<16x32xf32>
    %133 = arith.addf %131, %132 : vector<16x32xf32>
    %134 = arith.truncf %133 : vector<16x32xf32> to vector<16x32xbf16>
    %c0_42 = arith.constant 0 : index
    %c0_43 = arith.constant 0 : index
    %135 = vector.load %arg10[%c0_42, %c0_43] : memref<32x128xbf16, #tpu.memory_space<vmem>>, vector<32x128xbf16>
    %cst_44 = arith.constant dense<0.000000e+00> : vector<16x128xf32>
    %136 = tpu.matmul %134, %135, %cst_44 {dimension_numbers = #tpu.dot_dimension_numbers<[1], [0], [0], [1], [0, 0, 1, 1], [], []>} : vector<16x32xbf16>, vector<32x128xbf16>, vector<16x128xf32> -> vector<16x128xf32>
    %c0_45 = arith.constant 0 : index
    %c0_46 = arith.constant 0 : index
    %137 = vector.load %arg11[%c0_45, %c0_46] : memref<1x128xf32, #tpu.memory_space<vmem>>, vector<1x128xf32>
    %138 = vector.broadcast %137 : vector<1x128xf32> to vector<16x128xf32>
    %139 = arith.addf %136, %138 : vector<16x128xf32>
    %cst_47 = arith.constant 0.636619746 : f32
    %140 = math.sqrt %cst_47 : f32
    %cst_48 = arith.constant 5.000000e-01 : f32
    %141 = vector.broadcast %cst_48 : f32 to vector<16x128xf32>
    %142 = arith.mulf %141, %139 : vector<16x128xf32>
    %cst_49 = arith.constant 4.471500e-02 : f32
    %143 = vector.broadcast %cst_49 : f32 to vector<16x128xf32>
    %144 = arith.mulf %143, %139 : vector<16x128xf32>
    %145 = arith.mulf %144, %139 : vector<16x128xf32>
    %146 = arith.mulf %145, %139 : vector<16x128xf32>
    %147 = arith.addf %139, %146 : vector<16x128xf32>
    %148 = vector.broadcast %140 : f32 to vector<16x128xf32>
    %149 = arith.mulf %148, %147 : vector<16x128xf32>
    %150 = math.tanh %149 : vector<16x128xf32>
    %cst_50 = arith.constant 1.000000e+00 : f32
    %151 = vector.broadcast %cst_50 : f32 to vector<16x128xf32>
    %152 = arith.addf %151, %150 : vector<16x128xf32>
    %153 = arith.mulf %142, %152 : vector<16x128xf32>
    %154 = arith.truncf %153 : vector<16x128xf32> to vector<16x128xbf16>
    %c0_51 = arith.constant 0 : index
    %c0_52 = arith.constant 0 : index
    %155 = vector.load %arg12[%c0_51, %c0_52] : memref<128x32xbf16, #tpu.memory_space<vmem>>, vector<128x32xbf16>
    %cst_53 = arith.constant dense<0.000000e+00> : vector<16x32xf32>
    %156 = tpu.matmul %154, %155, %cst_53 {dimension_numbers = #tpu.dot_dimension_numbers<[1], [0], [0], [1], [0, 0, 1, 1], [], []>} : vector<16x128xbf16>, vector<128x32xbf16>, vector<16x32xf32> -> vector<16x32xf32>
    %c0_54 = arith.constant 0 : index
    %c0_55 = arith.constant 0 : index
    %157 = vector.load %arg13[%c0_54, %c0_55] : memref<1x32xf32, #tpu.memory_space<vmem>>, vector<1x32xf32>
    %158 = vector.broadcast %157 : vector<1x32xf32> to vector<16x32xf32>
    %159 = arith.addf %156, %158 : vector<16x32xf32>
    %160 = arith.addf %159, %126 : vector<16x32xf32>
    %161 = vector.shape_cast %160 : vector<16x32xf32> to vector<2x8x32xf32>
    %c0_56 = arith.constant 0 : index
    %c0_57 = arith.constant 0 : index
    %c0_58 = arith.constant 0 : index
    %162 = vector.load %arg14[%c0_56, %c0_57, %c0_58] : memref<2x8x32xf32, #tpu.memory_space<vmem>>, vector<2x8x32xf32>
    tpu.vector_store %arg14[%c0_56, %c0_57, %c0_58], %161 {strides = array<i32>} : memref<2x8x32xf32, #tpu.memory_space<vmem>>, vector<2x8x32xf32>,
    return
  }
  func.func @transform_0(%arg0: i32) -> (i32, i32, i32) {
    %c0_i32 = arith.constant 0 : i32
    %c0_i32_0 = arith.constant 0 : i32
    %c0_i32_1 = arith.constant 0 : i32
    %c0_i32_2 = arith.constant 0 : i32
    return %c0_i32, %c0_i32_0, %c0_i32_1 : i32, i32, i32
  }
  func.func @transform_1(%arg0: i32) -> (i32, i32) {
    %c0_i32 = arith.constant 0 : i32
    %c0_i32_0 = arith.constant 0 : i32
    %c0_i32_1 = arith.constant 0 : i32
    return %c0_i32, %c0_i32_0 : i32, i32
  }
  func.func @transform_2(%arg0: i32) -> (i32, i32) {
    %c0_i32 = arith.constant 0 : i32
    %c0_i32_0 = arith.constant 0 : i32
    %c0_i32_1 = arith.constant 0 : i32
    return %c0_i32, %c0_i32_0 : i32, i32
  }
  func.func @transform_3(%arg0: i32) -> (i32, i32) {
    %c0_i32 = arith.constant 0 : i32
    %c0_i32_0 = arith.constant 0 : i32
    %c0_i32_1 = arith.constant 0 : i32
    return %c0_i32, %c0_i32_0 : i32, i32
  }
  func.func @transform_4(%arg0: i32) -> (i32, i32) {
    %c0_i32 = arith.constant 0 : i32
    %c0_i32_0 = arith.constant 0 : i32
    %c0_i32_1 = arith.constant 0 : i32
    return %c0_i32, %c0_i32_0 : i32, i32
  }
  func.func @transform_5(%arg0: i32) -> (i32, i32) {
    %c0_i32 = arith.constant 0 : i32
    %c0_i32_0 = arith.constant 0 : i32
    %c0_i32_1 = arith.constant 0 : i32
    return %c0_i32, %c0_i32_0 : i32, i32
  }
  func.func @transform_6(%arg0: i32) -> (i32, i32) {
    %c0_i32 = arith.constant 0 : i32
    %c0_i32_0 = arith.constant 0 : i32
    %c0_i32_1 = arith.constant 0 : i32
    return %c0_i32, %c0_i32_0 : i32, i32
  }
  func.func @transform_7(%arg0: i32) -> (i32, i32) {
    %c0_i32 = arith.constant 0 : i32
    %c0_i32_0 = arith.constant 0 : i32
    %c0_i32_1 = arith.constant 0 : i32
    return %c0_i32, %c0_i32_0 : i32, i32
  }
  func.func @transform_8(%arg0: i32) -> (i32, i32) {
    %c0_i32 = arith.constant 0 : i32
    %c0_i32_0 = arith.constant 0 : i32
    %c0_i32_1 = arith.constant 0 : i32
    return %c0_i32, %c0_i32_0 : i32, i32
  }
  func.func @transform_9(%arg0: i32) -> (i32, i32) {
    %c0_i32 = arith.constant 0 : i32
    %c0_i32_0 = arith.constant 0 : i32
    %c0_i32_1 = arith.constant 0 : i32
    return %c0_i32, %c0_i32_0 : i32, i32
  }
  func.func @transform_10(%arg0: i32) -> (i32, i32) {
    %c0_i32 = arith.constant 0 : i32
    %c0_i32_0 = arith.constant 0 : i32
    %c0_i32_1 = arith.constant 0 : i32
    return %c0_i32, %c0_i32_0 : i32, i32
  }
  func.func @transform_11(%arg0: i32) -> (i32, i32) {
    %c0_i32 = arith.constant 0 : i32
    %c0_i32_0 = arith.constant 0 : i32
    %c0_i32_1 = arith.constant 0 : i32
    return %c0_i32, %c0_i32_0 : i32, i32
  }
  func.func @transform_12(%arg0: i32) -> (i32, i32) {
    %c0_i32 = arith.constant 0 : i32
    %c0_i32_0 = arith.constant 0 : i32
    %c0_i32_1 = arith.constant 0 : i32
    return %c0_i32, %c0_i32_0 : i32, i32
  }
  func.func @transform_13(%arg0: i32) -> (i32, i32, i32) {
    %c0_i32 = arith.constant 0 : i32
    %c0_i32_0 = arith.constant 0 : i32
    %c0_i32_1 = arith.constant 0 : i32
    %c0_i32_2 = arith.constant 0 : i32
    return %c0_i32, %c0_i32_0, %c0_i32_1 : i32, i32, i32
  }
}

</mosaic_0001>

<bundles_post_ra>
// kernel: tpu_custom_call.1
= control target key start
LH: loop header
LB: loop body
LE: loop exit
PB: predicated region body
PF: predicated region fallthrough
CT: control target
= control target key end

     0   :  { %19 = vsyncpa [#allocation5], 0  ;;  %s1443_s0 = inlined_call_operand.vmem [shape: f32[2,8,32], index: 0, kind: input, shape index: {}]   ;;  %s1444_s1 = inlined_call_operand.<no memory space> [shape: f32[1,1], index: 1, kind: input, shape index: {}]   ;;  %s1445_s2 = inlined_call_operand.vmem [shape: f32[1,32], index: 2, kind: input, shape index: {}]   ;;  %s1446_s3 = inlined_call_operand.vmem [shape: f32[1,32], index: 3, kind: input, shape index: {}]   ;;  %s1447_s4 = inlined_call_operand.vmem [shape: bf16[32,32], index: 4, kind: input, shape index: {}]   ;;  %s1448_s5 = inlined_call_operand.vmem [shape: bf16[32,32], index: 5, kind: input, shape index: {}]   ;;  %s1449_s6 = inlined_call_operand.vmem [shape: bf16[32,32], index: 6, kind: input, shape index: {}]   ;;  %s1450_s7 = inlined_call_operand.vmem [shape: bf16[32,32], index: 7, kind: input, shape index: {}]   ;;  %s1451_s8 = inlined_call_operand.vmem [shape: f32[1,32], index: 8, kind: input, shape index: {}]   ;;  %s1452_s9 = inlined_call_operand.hbm [shape: bf16[32,128], index: 9, kind: input, shape index: {}]   ;;  %s1453_s10 = inlined_call_operand.vmem [shape: f32[1,128], index: 10, kind: input, shape index: {}]   ;;  %s1454_s11 = inlined_call_operand.vmem [shape: bf16[128,32], index: 11, kind: input, shape index: {}]   ;;  %s1455_s12 = inlined_call_operand.vmem [shape: f32[1,32], index: 12, kind: input, shape index: {}]   ;;  %s1456_s13 = inlined_call_operand.hbm [shape: f32[2,8,32], index: 13, kind: output, shape index: {}]  }
   0x1   :  { %20 = vsyncpa [#allocation6], 0  ;;  %s43_s27 = sshll.u32 %s1452_s9, 4  ;;  %s1141_s28 = smov [#allocation4]   ;;  %s44_s27 = int_to_ptr.hbm [resolvable:$true] %s43_s27 }
   0x2   :  { %s45_s29 = sshll.u32 %s1141_s28, 4  ;;  %s1142_s30 = smov 64   ;;  %s46_s29 = int_to_ptr.vmem [resolvable:$true] %s45_s29 }
   0x3   :  { %s1143_s14 = smov 4  }
   0x4   :  { %51 = dma.hbm_to_vmem [thread:$0]  %s44_s27, 256, %s46_s29, [#allocation5], %s1142_s30, %s1142_s30, %s1143_s14  }
   0x5   :  { %1137 = dma.done.wait [#allocation5], 256  }
   0x6   :  { %1138 = vsyncadd [#allocation5], 4294967040  ;;  %v1229_v0 = vstv %s1444_s1  ;;  %v1013_v1 = vld [vmem:[%s1448_s5 + $0x8] sm:$0xff]  ;;  %v1237_v2 = vld [vmem:[%s1443_s0] sm:$0xff]  ;;  %vm100_vm0 = vcmask 261120   ;;  %vm268_vm1 = vcmask 64512   ;;  %v262_v49 = vlaneseq }
   0x7   :  { %v1242_v3 = vld [vmem:[%s1443_s0 + $0x8] sm:$0xff]  ;;  %v69_v4 = vmul.f32 %v1229_v0, %v1237_v2  ;;  %140 = vmatpush.bf16.msra.mxu2 %v1013_v1  ;;  %v1012_v5 = vld [vmem:[%s1448_s5] sm:$0xff]  ;;  %v1147_v58 = vmov 0.0   ;;  %vm520_vm3 = vcmask 1043456   ;;  %s1149_s16 = smov 16   ;;  %s1150_s17 = smov 24  }
   0x8   :  { %v70_v6 = vmul.f32 %v1229_v0, %v1242_v3  ;;  %v1011_v7 = vld [vmem:[%s1447_s4 + $0x8] sm:$0xff]  ;;  %v1010_v8 = vld [vmem:[%s1447_s4] sm:$0xff]  ;;  %s1146_s4 = smov 112   ;;  %v263_v53 = vshrl.u32 %v262_v49, 7  ;;  %v265_v54 = vand.u32 127, %v262_v49  ;;  %vm675_vm4 = vcmask 130112  }
   0x9   :  { %1045 = vtanh.f32 %v69_v4  ;;  %110 = vmatpush.bf16.msra.mxu0 %v1011_v7  ;;  %v1260_v9 = vld [vmem:[%s1445_s2] ss:$0 sm:$0xff]  ;;  %s1144_s2 = smov 120   ;;  %v1015_v28 = vld [vmem:[%s1449_s6 + $0x8] sm:$0xff]  ;;  %vm681_vm5 = vcmask 195712   ;;  %vm687_vm6 = vcmask 261312  }
   0xa   :  { %1047 = vtanh.f32 %v70_v6  ;;  %v1265_v10 = vld [vmem:[%s1446_s3] ss:$0 sm:$0xff]  ;;  %s1145_s3 = smov 104   ;;  %vm266_vm2 = vcmp.gt.s32.totalorder %v265_v54, %v263_v53  ;;  %s904_s9 = sshll.u32 %s1456_s13, 4  ;;  %s905_s9 = int_to_ptr.hbm [resolvable:$true] %s904_s9 }
   0xb   :  { %141 = vmatpush.bf16.msra.mxu2 %v1012_v5  ;;  %v1014_v29 = vld [vmem:[%s1449_s6] sm:$0xff]  ;;  %v267_v59 = vsel %vm266_vm2, -1e+30, %v1147_v58  ;;  %s1148_s6 = smov 8  }
   0xd   :  { %111 = vmatpush.bf16.msra.mxu0 %v1010_v8 }
   0xf   :  { %v1046_v11 = vpop.eup %1045  ;;  %170 = vmatpush.bf16.msrb.mxu2 %v1015_v28 }
  0x10   :  { %v1048_v12 = vpop.eup %1047  ;;  %v76_v13 = vmul.f32 %v1046_v11, %v1260_v9 }
  0x11   :  { %v77_v14 = vmul.f32 %v1048_v12, %v1260_v9 }
  0x12   :  { %v81_v15 = vadd.f32 %v1265_v10, %v76_v13 }
  0x13   :  { %v82_v16 = vadd.f32 %v1265_v10, %v77_v14  ;;  %171 = vmatpush.bf16.msrb.mxu2 %v1014_v29 }
  0x15   :  { %v83_v17 = vpack.c.bf16 %v82_v16, %v81_v15 }
  0x17   :  { %934 = vmatmul.msk.bf16.vlgmr.msra.gmra.mxu2 %vm100_vm0, %v83_v17  ;;  %925 = vmatmul.msk.bf16.vlgmr.msra.gmra.mxu0 %vm100_vm0, %v83_v17 }
  0x27   :  { %943 = vmatmul.msk.bf16.vlgmr.msrb.gmra.mxu2 %vm100_vm0, %v83_v17 }
  0x94   :  { %v113_v21 = vpop.f32.mrf.mxu0 }
  0x95   :  { %v198_v22 = vpack.c.bf16 %v113_v21, %v113_v21 }
  0x9a   :  { %v143_v18 = vpop.f32.mrf.mxu2 }
  0x9b   :  { %207 = vrot.lane.b32.xlu1 %v143_v18, %s1144_s2  ;;  %213 = vrot.lane.b32.xlu0 %v143_v18, %s1145_s3  ;;  %v226_v19 = vpack.c.bf16 %v143_v18, %v143_v18 }
  0x9c   :  { %v115_v26 = vpop.f32.mrf.mxu0 }
  0x9d   :  { %v273_v20 = vsel %vm268_vm1, %v226_v19, 0  ;;  %v202_v27 = vpack.c.bf16 %v115_v26, %v115_v26 }
  0x9e   :  { %282 = vmatpush.bf16.xpose.msra.mxu3 %v273_v20 }
  0xa2   :  { %v145_v23 = vpop.f32.mrf.mxu2 }
  0xa3   :  { %210 = vrot.lane.b32.xlu1 %v143_v18, %s1146_s4  ;;  %223 = vrot.lane.b32.xlu2 %v145_v23, %s1145_s3  ;;  %v230_v24 = vpack.c.bf16 %v145_v23, %v145_v23 }
  0xa4   :  { %185 = vrot.lane.b32.xlu0 %v113_v21, %s1145_s3 }
  0xa5   :  { %944 = vmatmul.msk.bf16.vlgmr.msra.gmra.mxu3 %vm268_vm1, %v198_v22  ;;  %v349_v25 = vsel %vm268_vm1, %v230_v24, 0 }
  0xa6   :  { %358 = vmatpush.bf16.xpose.msrb.mxu3 %v349_v25 }
  0xaa   :  { %v173_v14 = vpop.f32.mrf.mxu2 }
  0xab   :  { %179 = vrot.lane.b32.xlu2 %v113_v21, %s1144_s2  ;;  %195 = vrot.lane.b32.xlu1 %v115_v26, %s1145_s3  ;;  %v254_v16 = vpack.c.bf16 %v173_v14, %v173_v14 }
  0xac   :  { %182 = vrot.lane.b32.xlu0 %v113_v21, %s1146_s4 }
  0xad   :  { %v522_v18 = vsel %vm520_vm3, %v254_v16, 0 }
  0xae   :  { %531 = vmatpush.bf16.msra.mxu3 %v522_v18 }
  0xb2   :  { %v1316_v15 = vpop.f32.mrf.mxu2 }
  0xb3   :  { %217 = vrot.lane.b32.xlu2 %v145_v23, %s1144_s2  ;;  %189 = vrot.lane.b32.xlu1 %v115_v26, %s1144_s2  ;;  %v258_v17 = vpack.c.bf16 %v1316_v15, %v1316_v15 }
  0xb4   :  { %220 = vrot.lane.b32.xlu0 %v145_v23, %s1146_s4 }
  0xb5   :  { %948 = vmatmul.msk.bf16.vlgmr.msrb.gmra.mxu3 %vm268_vm1, %v202_v27  ;;  %v598_v19 = vsel %vm520_vm3, %v258_v17, 0 }
  0xb6   :  { %607 = vmatpush.bf16.msrb.mxu3 %v598_v19 }
  0xbb   :  { %192 = vrot.lane.b32.xlu2 %v115_v26, %s1146_s4 }
  0xfd   :  { %v224_v30 = vpop.permute.xlu2 %223 }
  0xfe   :  { %v233_v32 = vpack.c.bf16 %v224_v30, %v224_v30 }
 0x100   :  { %v406_v41 = vsel %vm268_vm1, %v233_v32, 0 }
 0x105   :  { %v180_v31 = vpop.permute.xlu2 %179 }
 0x106   :  { %v199_v44 = vpack.c.bf16 %v180_v31, %v180_v31 }
 0x10d   :  { %v208_v33 = vpop.permute.xlu1 %207  ;;  %v214_v34 = vpop.permute.xlu0 %213 }
 0x10e   :  { %v227_v35 = vpack.c.bf16 %v208_v33, %v208_v33  ;;  %v229_v36 = vpack.c.bf16 %v214_v34, %v214_v34  ;;  %v218_v37 = vpop.permute.xlu2 %217 }
 0x10f   :  { %v231_v38 = vpack.c.bf16 %v218_v37, %v218_v37 }
 0x110   :  { %v330_v39 = vsel %vm268_vm1, %v229_v36, 0  ;;  %v292_v40 = vsel %vm268_vm1, %v227_v35, 0 }
 0x111   :  { %v368_v42 = vsel %vm268_vm1, %v231_v38, 0  ;;  %301 = vmatpush.bf16.xpose.msrb.mxu0 %v292_v40  ;;  %339 = vmatpush.bf16.xpose.msra.mxu2 %v330_v39 }
 0x115   :  { %v211_v43 = vpop.permute.xlu1 %210 }
 0x116   :  { %v228_v45 = vpack.c.bf16 %v211_v43, %v211_v43  ;;  %v186_v46 = vpop.permute.xlu0 %185  ;;  %v193_v5 = vpop.permute.xlu2 %192 }
 0x117   :  { %v201_v47 = vpack.c.bf16 %v186_v46, %v186_v46  ;;  %v204_v6 = vpack.c.bf16 %v193_v5, %v193_v5 }
 0x118   :  { %945 = vmatmul.msk.bf16.vlgmr.msrb.gmra.mxu0 %vm268_vm1, %v199_v44  ;;  %v311_v48 = vsel %vm268_vm1, %v228_v45, 0 }
 0x119   :  { %377 = vmatpush.bf16.xpose.msra.mxu0 %v368_v42  ;;  %415 = vmatpush.bf16.xpose.msrb.mxu2 %v406_v41 }
 0x11a   :  { %947 = vmatmul.msk.bf16.vlgmr.msra.gmra.mxu2 %vm268_vm1, %v201_v47  ;;  %320 = vmatpush.bf16.xpose.msra.mxu1 %v311_v48 }
 0x11d   :  { %v196_v50 = vpop.permute.xlu1 %195 }
 0x11e   :  { %v183_v51 = vpop.permute.xlu0 %182  ;;  %v205_v60 = vpack.c.bf16 %v196_v50, %v196_v50 }
 0x11f   :  { %v200_v52 = vpack.c.bf16 %v183_v51, %v183_v51 }
 0x121   :  { %946 = vmatmul.msk.bf16.vlgmr.msra.gmra.mxu1 %vm268_vm1, %v200_v52 }
 0x125   :  { %v190_v55 = vpop.permute.xlu1 %189 }
 0x126   :  { %v221_v56 = vpop.permute.xlu0 %220  ;;  %v203_v57 = vpack.c.bf16 %v190_v55, %v190_v55 }
 0x127   :  { %v232_v61 = vpack.c.bf16 %v221_v56, %v221_v56 }
 0x128   :  { %v284_v62 = vpop.f32.mrf.mxu3  ;;  %949 = vmatmul.msk.bf16.vlgmr.msra.gmra.mxu0 %vm268_vm1, %v203_v57 }
 0x129   :  { %v1305_v63 = vadd.f32 %v284_v62, %v267_v59  ;;  %v387_v1 = vsel %vm268_vm1, %v232_v61, 0 }
 0x12a   :  { %951 = vmatmul.msk.bf16.vlgmr.msrb.gmra.mxu2 %vm268_vm1, %v205_v60  ;;  %396 = vmatpush.bf16.xpose.msrb.mxu1 %v387_v1 }
 0x12b   :  { %v421_v4 = vsel %vm268_vm1, %v1305_v63, -inf }
 0x12c   :  { %422 = vmax.xlane.f32.xlu2 %v421_v4 }
 0x130   :  { %v286_v7 = vpop.f32.mrf.mxu3 }
 0x131   :  { %950 = vmatmul.msk.bf16.vlgmr.msrb.gmra.mxu1 %vm268_vm1, %v204_v6 }
 0x138   :  { %v360_v8 = vpop.f32.mrf.mxu3 }
 0x139   :  { %v1312_v11 = vadd.f32 %v360_v8, %v267_v59 }
 0x13b   :  { %v433_v12 = vsel %vm268_vm1, %v1312_v11, -inf }
 0x13c   :  { %434 = vmax.xlane.f32.xlu0 %v433_v12 }
 0x140   :  { %v362_v13 = vpop.f32.mrf.mxu3 }
 0x195   :  { %v303_v20 = vpop.f32.mrf.mxu0 }
 0x196   :  { %v304_v21 = vadd.f32 %v303_v20, %v267_v59 }
 0x198   :  { %v424_v22 = vsel %vm268_vm1, %v304_v21, -inf }
 0x199   :  { %425 = vmax.xlane.f32.xlu1 %v424_v22 }
 0x19d   :  { %v341_v23 = vpop.f32.mrf.mxu2  ;;  %v305_v25 = vpop.f32.mrf.mxu0 }
 0x19e   :  { %v342_v24 = vadd.f32 %v341_v23, %v267_v59  ;;  %v322_v26 = vpop.f32.mrf.mxu1 }
 0x19f   :  { %v323_v27 = vadd.f32 %v322_v26, %v267_v59  ;;  %v423_v46 = vpop.xlane.xlu2 %422 }
 0x1a0   :  { %v430_v28 = vsel %vm268_vm1, %v342_v24, -inf }
 0x1a1   :  { %431 = vmax.xlane.f32.xlu0 %v430_v28  ;;  %v427_v29 = vsel %vm268_vm1, %v323_v27, -inf }
 0x1a2   :  { %428 = vmax.xlane.f32.xlu2 %v427_v29 }
 0x1a5   :  { %v343_v30 = vpop.f32.mrf.mxu2  ;;  %v379_v31 = vpop.f32.mrf.mxu0 }
 0x1a6   :  { %v324_v32 = vpop.f32.mrf.mxu1  ;;  %v380_v33 = vadd.f32 %v379_v31, %v267_v59 }
 0x1a8   :  { %v436_v34 = vsel %vm268_vm1, %v380_v33, -inf }
 0x1a9   :  { %437 = vmax.xlane.f32.xlu0 %v436_v34 }
 0x1ad   :  { %v417_v35 = vpop.f32.mrf.mxu2  ;;  %v381_v37 = vpop.f32.mrf.mxu0 }
 0x1ae   :  { %v418_v36 = vadd.f32 %v417_v35, %v267_v59  ;;  %v398_v38 = vpop.f32.mrf.mxu1 }
 0x1af   :  { %v399_v42 = vadd.f32 %v398_v38, %v267_v59  ;;  %v1331_v44 = vpop.xlane.xlu0 %434 }
 0x1b0   :  { %v442_v39 = vsel %vm268_vm1, %v418_v36, -inf  ;;  %v449_v31 = vsub.f32 %v1312_v11, %v1331_v44 }
 0x1b1   :  { %443 = vmax.xlane.f32.xlu2 %v442_v39  ;;  %v439_v43 = vsel %vm268_vm1, %v399_v42, -inf }
 0x1b2   :  { %241 = vrot.lane.b32.xlu1 %v173_v14, %s1145_s3 }
 0x1b5   :  { %v419_v40 = vpop.f32.mrf.mxu2 }
 0x1b6   :  { %v400_v41 = vpop.f32.mrf.mxu1 }
 0x1bd   :  { %238 = vrot.lane.b32.xlu0 %v173_v14, %s1146_s4 }
 0x1c9   :  { %235 = vrot.lane.b32.xlu2 %v173_v14, %s1144_s2 }
 0x1dc   :  { %440 = vmax.xlane.f32.xlu1 %v439_v43 }
 0x20c   :  { %v426_v45 = vpop.xlane.xlu1 %425 }
 0x20d   :  { %v446_v47 = vsub.f32 %v304_v21, %v426_v45 }
 0x20f   :  { %v455_v48 = vmul.f32 1.442695, %v446_v47 }
 0x211   :  { %1049 = vpow2.f32 %v455_v48 }
 0x214   :  { %v432_v49 = vpop.xlane.xlu0 %431 }
 0x215   :  { %v448_v50 = vsub.f32 %v342_v24, %v432_v49  ;;  %v429_v51 = vpop.xlane.xlu2 %428 }
 0x216   :  { %v447_v53 = vsub.f32 %v323_v27, %v429_v51  ;;  %v445_v27 = vsub.f32 %v1305_v63, %v423_v46 }
 0x217   :  { %v459_v52 = vmul.f32 1.442695, %v448_v50  ;;  %v1333_v54 = vpop.eup %1049 }
 0x218   :  { %v457_v55 = vmul.f32 1.442695, %v447_v53  ;;  %v472_v56 = vsel %vm268_vm1, %v1333_v54, 0.0  ;;  %v453_v29 = vmul.f32 1.442695, %v445_v27 }
 0x219   :  { %1051 = vpow2.f32 %v459_v52  ;;  %473 = vadd.xlane.f32.xlu2 %v472_v56 }
 0x21a   :  { %1053 = vpow2.f32 %v457_v55 }
 0x21c   :  { %v438_v57 = vpop.xlane.xlu0 %437 }
 0x21d   :  { %v450_v58 = vsub.f32 %v380_v33, %v438_v57  ;;  %v461_v33 = vmul.f32 1.442695, %v449_v31 }
 0x21f   :  { %v1337_v59 = vpop.eup %1051  ;;  %v463_v60 = vmul.f32 1.442695, %v450_v58 }
 0x220   :  { %v478_v61 = vsel %vm268_vm1, %v1337_v59, 0.0  ;;  %v1341_v62 = vpop.eup %1053 }
 0x221   :  { %479 = vadd.xlane.f32.xlu1 %v478_v61  ;;  %1055 = vpow2.f32 %v463_v60  ;;  %v475_v1 = vsel %vm268_vm1, %v1341_v62, 0.0 }
 0x222   :  { %476 = vadd.xlane.f32.xlu0 %v475_v1 }
 0x224   :  { %v444_v4 = vpop.xlane.xlu2 %443  ;;  %v242_v6 = vpop.permute.xlu1 %241 }
 0x225   :  { %v452_v5 = vsub.f32 %v418_v36, %v444_v4  ;;  %v257_v7 = vpack.c.bf16 %v242_v6, %v242_v6 }
 0x227   :  { %v467_v8 = vmul.f32 1.442695, %v452_v5  ;;  %v1056_v12 = vpop.eup %1055  ;;  %v579_v13 = vsel %vm520_vm3, %v257_v7, 0 }
 0x228   :  { %588 = vmatpush.bf16.msra.mxu2 %v579_v13  ;;  %v484_v14 = vsel %vm268_vm1, %v1056_v12, 0.0 }
 0x229   :  { %1057 = vpow2.f32 %v467_v8 }
 0x22a   :  { %485 = vadd.xlane.f32.xlu0 %v484_v14 }
 0x22c   :  { %v236_v16 = vpop.permute.xlu2 %235 }
 0x22d   :  { %v255_v17 = vpack.c.bf16 %v236_v16, %v236_v16 }
 0x22f   :  { %v1347_v18 = vpop.eup %1057  ;;  %v541_v19 = vsel %vm520_vm3, %v255_v17, 0  ;;  %v239_v21 = vpop.permute.xlu0 %238 }
 0x230   :  { %550 = vmatpush.bf16.msrb.mxu0 %v541_v19  ;;  %v490_v20 = vsel %vm268_vm1, %v1347_v18, 0.0  ;;  %v256_v22 = vpack.c.bf16 %v239_v21, %v239_v21 }
 0x231   :  { %491 = vadd.xlane.f32.xlu1 %v490_v20 }
 0x232   :  { %v560_v23 = vsel %vm520_vm3, %v256_v22, 0 }
 0x233   :  { %569 = vmatpush.bf16.msra.mxu1 %v560_v23 }
 0x23e   :  { %245 = vrot.lane.b32.xlu0 %v1316_v15, %s1144_s2 }
 0x24a   :  { %251 = vrot.lane.b32.xlu1 %v1316_v15, %s1145_s3 }
 0x24f   :  { %v441_v24 = vpop.xlane.xlu1 %440 }
 0x250   :  { %v451_v25 = vsub.f32 %v399_v42, %v441_v24 }
 0x252   :  { %v465_v26 = vmul.f32 1.442695, %v451_v25 }
 0x254   :  { %1059 = vpow2.f32 %v465_v26 }
 0x255   :  { %1061 = vpow2.f32 %v453_v29 }
 0x256   :  { %1063 = vpow2.f32 %v461_v33 }
 0x25a   :  { %v1060_v28 = vpop.eup %1059 }
 0x25b   :  { %v487_v30 = vsel %vm268_vm1, %v1060_v28, 0.0  ;;  %v1062_v32 = vpop.eup %1061 }
 0x25c   :  { %488 = vadd.xlane.f32.xlu2 %v487_v30  ;;  %v469_v34 = vsel %vm268_vm1, %v1062_v32, 0.0  ;;  %v1064_v35 = vpop.eup %1063 }
 0x25d   :  { %v481_v36 = vsel %vm268_vm1, %v1064_v35, 0.0 }
 0x268   :  { %470 = vadd.xlane.f32.xlu0 %v469_v34 }
 0x274   :  { %482 = vadd.xlane.f32.xlu1 %v481_v36  ;;  %248 = vrot.lane.b32.xlu2 %v1316_v15, %s1146_s4 }
 0x28c   :  { %v474_v63 = vpop.xlane.xlu2 %473 }
 0x28d   :  { %1065 = vrcp.f32 %v474_v63 }
 0x293   :  { %v1066_v37 = vpop.eup %1065 }
 0x294   :  { %v480_v38 = vpop.xlane.xlu1 %479  ;;  %v502_v39 = vmul.f32 %v1066_v37, %v1333_v54  ;;  %v1017_v37 = vld [vmem:[%s1450_s7 + $0x8] sm:$0xff] }
 0x295   :  { %1067 = vrcp.f32 %v480_v38  ;;  %v477_v11 = vpop.xlane.xlu0 %476  ;;  %v1016_v38 = vld [vmem:[%s1450_s7] sm:$0xff] }
 0x296   :  { %v510_v40 = vpack.c.bf16 %v502_v39, %v502_v39  ;;  %1069 = vrcp.f32 %v477_v11 }
 0x298   :  { %953 = vmatmul.msk.bf16.vlgmr.msrb.gmra.mxu0 %vm268_vm1, %v510_v40 }
 0x29b   :  { %v1068_v41 = vpop.eup %1067 }
 0x29c   :  { %v504_v42 = vmul.f32 %v1068_v41, %v1337_v59  ;;  %v1070_v43 = vpop.eup %1069 }
 0x29d   :  { %v503_v45 = vmul.f32 %v1070_v43, %v1341_v62  ;;  %v486_v46 = vpop.xlane.xlu0 %485 }
 0x29e   :  { %v512_v44 = vpack.c.bf16 %v504_v42, %v504_v42  ;;  %1071 = vrcp.f32 %v486_v46 }
 0x29f   :  { %v511_v15 = vpack.c.bf16 %v503_v45, %v503_v45  ;;  %v1018_v45 = vld [vmem:[#allocation4] sm:$0xff] }
 0x2a0   :  { %955 = vmatmul.msk.bf16.vlgmr.msra.gmra.mxu2 %vm268_vm1, %v512_v44  ;;  %v1019_v44 = vld [vmem:[#allocation4 + $0x8] sm:$0xff] }
 0x2a1   :  { %954 = vmatmul.msk.bf16.vlgmr.msra.gmra.mxu1 %vm268_vm1, %v511_v15  ;;  %v1042_v15 = vld [vmem:[%s1451_s8] ss:$0 sm:$0xff] }
 0x2a4   :  { %v1072_v47 = vpop.eup %1071  ;;  %v492_v48 = vpop.xlane.xlu1 %491 }
 0x2a5   :  { %v506_v50 = vmul.f32 %v1072_v47, %v1056_v12  ;;  %1073 = vrcp.f32 %v492_v48 }
 0x2a7   :  { %v514_v53 = vpack.c.bf16 %v506_v50, %v506_v50 }
 0x2ab   :  { %v1074_v54 = vpop.eup %1073 }
 0x2ac   :  { %v508_v56 = vmul.f32 %v1074_v54, %v1347_v18 }
 0x2ae   :  { %v516_v59 = vpack.c.bf16 %v508_v56, %v508_v56 }
 0x2b0   :  { %v246_v49 = vpop.permute.xlu0 %245 }
 0x2b1   :  { %v259_v51 = vpack.c.bf16 %v246_v49, %v246_v49 }
 0x2b3   :  { %v617_v52 = vsel %vm520_vm3, %v259_v51, 0 }
 0x2b4   :  { %626 = vmatpush.bf16.msra.mxu0 %v617_v52 }
 0x2b7   :  { %957 = vmatmul.msk.bf16.vlgmr.msra.gmra.mxu0 %vm268_vm1, %v514_v53 }
 0x2b8   :  { %785 = vmatpush.bf16.msrb.mxu0 %v1019_v44 }
 0x2bc   :  { %v252_v55 = vpop.permute.xlu1 %251  ;;  %786 = vmatpush.bf16.msrb.mxu0 %v1018_v45 }
 0x2bd   :  { %v261_v57 = vpack.c.bf16 %v252_v55, %v252_v55 }
 0x2bf   :  { %v655_v58 = vsel %vm520_vm3, %v261_v57, 0 }
 0x2c0   :  { %664 = vmatpush.bf16.msrb.mxu2 %v655_v58 }
 0x2c3   :  { %959 = vmatmul.msk.bf16.vlgmr.msrb.gmra.mxu2 %vm268_vm1, %v516_v59 }
 0x2cf   :  { %v489_v60 = vpop.xlane.xlu2 %488 }
 0x2d0   :  { %1075 = vrcp.f32 %v489_v60  ;;  %v1023_v60 = vld [vmem:[%s1454_s11 + $0x18] sm:$0xff] }
 0x2d6   :  { %v1076_v61 = vpop.eup %1075 }
 0x2d7   :  { %v249_v62 = vpop.permute.xlu2 %248  ;;  %v507_v1 = vmul.f32 %v1076_v61, %v1060_v28  ;;  %v1022_v61 = vld [vmem:[%s1454_s11 + $0x10] sm:$0xff] }
 0x2d8   :  { %v260_v4 = vpack.c.bf16 %v249_v62, %v249_v62  ;;  %v1021_v62 = vld [vmem:[%s1454_s11 + $0x8] sm:$0xff] }
 0x2d9   :  { %v515_v7 = vpack.c.bf16 %v507_v1, %v507_v1  ;;  %v1020_v1 = vld [vmem:[%s1454_s11] sm:$0xff] }
 0x2da   :  { %v636_v5 = vsel %vm520_vm3, %v260_v4, 0  ;;  %v1043_v4 = vld [vmem:[%s1453_s10] ss:$0 sm:$0xff] }
 0x2db   :  { %v471_v6 = vpop.xlane.xlu0 %470  ;;  %645 = vmatpush.bf16.msrb.mxu1 %v636_v5 }
 0x2dc   :  { %1077 = vrcp.f32 %v471_v6 }
 0x2de   :  { %958 = vmatmul.msk.bf16.vlgmr.msrb.gmra.mxu1 %vm268_vm1, %v515_v7 }
 0x2e2   :  { %v1078_v8 = vpop.eup %1077 }
 0x2e3   :  { %v501_v12 = vmul.f32 %v1078_v8, %v1062_v32 }
 0x2e5   :  { %v509_v13 = vpack.c.bf16 %v501_v12, %v501_v12 }
 0x2e7   :  { %v483_v14 = vpop.xlane.xlu1 %482  ;;  %952 = vmatmul.msk.bf16.vlgmr.msra.gmra.mxu3 %vm268_vm1, %v509_v13 }
 0x2e8   :  { %1079 = vrcp.f32 %v483_v14  ;;  %737 = vmatpush.bf16.msra.mxu3 %v1017_v37 }
 0x2ec   :  { %738 = vmatpush.bf16.msra.mxu3 %v1016_v38 }
 0x2ee   :  { %v1080_v16 = vpop.eup %1079 }
 0x2ef   :  { %v505_v17 = vmul.f32 %v1080_v16, %v1064_v35 }
 0x2f1   :  { %v513_v18 = vpack.c.bf16 %v505_v17, %v505_v17 }
 0x2f7   :  { %956 = vmatmul.msk.bf16.vlgmr.msrb.gmra.mxu3 %vm268_vm1, %v513_v18 }
 0x315   :  { %v552_v19 = vpop.f32.mrf.mxu0 }
 0x316   :  { %672 = vrot.lane.b32.xlu2 %v552_v19, %s1148_s6 }
 0x31d   :  { %v554_v20 = vpop.f32.mrf.mxu0 }
 0x31e   :  { %v571_v21 = vpop.f32.mrf.mxu1 }
 0x31f   :  { %678 = vrot.lane.b32.xlu2 %v571_v21, %s1149_s16 }
 0x323   :  { %v590_v22 = vpop.f32.mrf.mxu2 }
 0x326   :  { %v573_v23 = vpop.f32.mrf.mxu1 }
 0x32b   :  { %v592_v24 = vpop.f32.mrf.mxu2 }
 0x334   :  { %v628_v25 = vpop.f32.mrf.mxu0 }
 0x335   :  { %691 = vrot.lane.b32.xlu2 %v628_v25, %s1148_s6 }
 0x33c   :  { %v630_v26 = vpop.f32.mrf.mxu0 }
 0x346   :  { %v666_v27 = vpop.f32.mrf.mxu2 }
 0x347   :  { %701 = vrot.lane.b32.xlu0 %v666_v27, %s1150_s17 }
 0x34e   :  { %v668_v28 = vpop.f32.mrf.mxu2 }
 0x35b   :  { %v647_v29 = vpop.f32.mrf.mxu1 }
 0x35c   :  { %696 = vrot.lane.b32.xlu2 %v647_v29, %s1149_s16  ;;  %s1151_s16 = smov [#allocation7]  }
 0x363   :  { %v649_v30 = vpop.f32.mrf.mxu1 }
 0x364   :  { %684 = vrot.lane.b32.xlu2 %v590_v22, %s1150_s17  ;;  %s902_s17 = sshll.u32 %s1151_s16, 4  ;;  %s903_s17 = int_to_ptr.vmem [resolvable:$true] %s902_s17 }
 0x36a   :  { %v533_v31 = vpop.f32.mrf.mxu3 }
 0x36b   :  { %670 = vst.msk [vmem:[#allocation2] sm:$0xff] %vm268_vm1, %v533_v31 }
 0x370   :  { %v673_v32 = vpop.permute.xlu2 %672 }
 0x371   :  { %676 = vst.msk [vmem:[#allocation2] sm:$0xff] %vm675_vm4, %v673_v32  ;;  %v1044_v32 = vld [vmem:[%s1455_s12] ss:$0 sm:$0xff]  ;;  %s1152_s12 = smov 128  }
 0x372   :  { %v535_v33 = vpop.f32.mrf.mxu3 }
 0x379   :  { %v679_v34 = vpop.permute.xlu2 %678 }
 0x37a   :  { %682 = vst.msk [vmem:[#allocation2] sm:$0xff] %vm681_vm5, %v679_v34  ;;  %v609_v35 = vpop.f32.mrf.mxu3 }
 0x37b   :  { %689 = vst.msk [vmem:[#allocation2 + $0x8] sm:$0xff] %vm268_vm1, %v609_v35 }
 0x382   :  { %v611_v36 = vpop.f32.mrf.mxu3 }
 0x38f   :  { %v692_v63 = vpop.permute.xlu2 %691 }
 0x390   :  { %694 = vst.msk [vmem:[#allocation2 + $0x8] sm:$0xff] %vm675_vm4, %v692_v63 }
 0x3b6   :  { %v697_v39 = vpop.permute.xlu2 %696 }
 0x3b7   :  { %699 = vst.msk [vmem:[#allocation2 + $0x8] sm:$0xff] %vm681_vm5, %v697_v39 }
 0x3b9   :  { %v702_v11 = vpop.permute.xlu0 %701 }
 0x3ba   :  { %704 = vst.msk [vmem:[#allocation2 + $0x8] sm:$0xff] %vm687_vm6, %v702_v11 }
 0x3be   :  { %v685_v40 = vpop.permute.xlu2 %684 }
 0x3bf   :  { %688 = vst.msk [vmem:[#allocation2] sm:$0xff] %vm687_vm6, %v685_v40 }
 0x3c1   :  { %v706_v42 = vld [vmem:[#allocation2 + $0x8] sm:$0xff] }
 0x3c6   :  { %v705_v41 = vld [vmem:[#allocation2] sm:$0xff] }
 0x3c7   :  { %v707_v43 = vpack.c.bf16 %v706_v42, %v705_v41 }
 0x3c9   :  { %968 = vmatmul.msk.bf16.vlgmr.msra.gmra.mxu3 %vm100_vm0, %v707_v43 }
 0x44c   :  { %v740_v46 = vpop.f32.mrf.mxu3 }
 0x44d   :  { %v741_v47 = vadd.f32 %v1042_v15, %v740_v46 }
 0x44f   :  { %v745_v48 = vadd.f32 %v741_v47, %v1237_v2 }
 0x451   :  { %v747_v49 = vmul.f32 %v745_v48, %v1229_v0 }
 0x453   :  { %1081 = vtanh.f32 %v747_v49 }
 0x454   :  { %v742_v50 = vpop.f32.mrf.mxu3 }
 0x455   :  { %v743_v51 = vadd.f32 %v1042_v15, %v742_v50 }
 0x457   :  { %v1397_v52 = vadd.f32 %v743_v51, %v1242_v3  ;;  %v1027_v3 = vld [vmem:[%s1454_s11 + $0x38] sm:$0xff] }
 0x458   :  { %880 = vmatpush.bf16.msra.mxu1 %v1027_v3 }
 0x459   :  { %v748_v53 = vmul.f32 %v1397_v52, %v1229_v0  ;;  %v1082_v54 = vpop.eup %1081  ;;  %v1026_v0 = vld [vmem:[%s1454_s11 + $0x30] sm:$0xff] }
 0x45a   :  { %v751_v55 = vmul.f32 %v1082_v54, %v1260_v9 }
 0x45b   :  { %1083 = vtanh.f32 %v748_v53 }
 0x45c   :  { %v753_v2 = vadd.f32 %v1265_v10, %v751_v55  ;;  %881 = vmatpush.bf16.msra.mxu1 %v1026_v0 }
 0x461   :  { %v1084_v56 = vpop.eup %1083 }
 0x462   :  { %v752_v57 = vmul.f32 %v1084_v56, %v1260_v9  ;;  %v1025_v9 = vld [vmem:[%s1454_s11 + $0x28] sm:$0xff] }
 0x463   :  { %882 = vmatpush.bf16.msra.mxu1 %v1025_v9 }
 0x464   :  { %v754_v58 = vadd.f32 %v1265_v10, %v752_v57  ;;  %v1024_v10 = vld [vmem:[%s1454_s11 + $0x20] sm:$0xff] }
 0x466   :  { %v755_v59 = vpack.c.bf16 %v754_v58, %v753_v2 }
 0x467   :  { %883 = vmatpush.bf16.msra.mxu1 %v1024_v10 }
 0x468   :  { %977 = vmatmul.msk.bf16.vlgmr.msrb.gmra.mxu0 %vm100_vm0, %v755_v59 }
 0x46b   :  { %884 = vmatpush.bf16.msra.mxu1 %v1023_v60 }
 0x46f   :  { %885 = vmatpush.bf16.msra.mxu1 %v1022_v61 }
 0x473   :  { %886 = vmatpush.bf16.msra.mxu1 %v1021_v62 }
 0x477   :  { %887 = vmatpush.bf16.msra.mxu1 %v1020_v1 }
 0x4e5   :  { %v788_v5 = vpop.f32.mrf.mxu0 }
 0x4e6   :  { %v789_v6 = vadd.f32 %v1043_v4, %v788_v5 }
 0x4e8   :  { %v795_v7 = vmul.f32 0.044715, %v789_v6  ;;  %v793_v26 = vmul.f32 0.5, %v789_v6 }
 0x4ea   :  { %v797_v8 = vmul.f32 %v795_v7, %v789_v6 }
 0x4ec   :  { %v799_v12 = vmul.f32 %v797_v8, %v789_v6 }
 0x4ed   :  { %v790_v13 = vpop.f32.mrf.mxu0 }
 0x4ee   :  { %v801_v14 = vadd.f32 %v799_v12, %v789_v6  ;;  %v791_v16 = vadd.f32 %v1043_v4, %v790_v13 }
 0x4f0   :  { %v796_v17 = vmul.f32 0.044715, %v791_v16  ;;  %v803_v18 = vmul.f32 0.7978845, %v801_v14  ;;  %v794_v27 = vmul.f32 0.5, %v791_v16 }
 0x4f2   :  { %v798_v19 = vmul.f32 %v796_v17, %v791_v16  ;;  %1085 = vtanh.f32 %v803_v18 }
 0x4f4   :  { %v800_v20 = vmul.f32 %v798_v19, %v791_v16 }
 0x4f6   :  { %v802_v21 = vadd.f32 %v800_v20, %v791_v16 }
 0x4f8   :  { %v804_v22 = vmul.f32 0.7978845, %v802_v21  ;;  %v1086_v23 = vpop.eup %1085 }
 0x4f9   :  { %v807_v24 = vadd.f32 1.0, %v1086_v23 }
 0x4fa   :  { %1087 = vtanh.f32 %v804_v22 }
 0x4fb   :  { %v809_v29 = vmul.f32 %v807_v24, %v793_v26 }
 0x500   :  { %v1088_v25 = vpop.eup %1087 }
 0x501   :  { %v808_v28 = vadd.f32 1.0, %v1088_v25 }
 0x503   :  { %v810_v30 = vmul.f32 %v808_v28, %v794_v27 }
 0x505   :  { %v811_v31 = vpack.c.bf16 %v810_v30, %v809_v29 }
 0x507   :  { %888 = vmatmul.bf16.vlgmr.msra.gmra.mxu1 %v811_v31 }
 0x584   :  { %v889_v33 = vpop.f32.mrf.mxu1 }
 0x585   :  { %v890_v34 = vadd.f32 %v1044_v32, %v889_v33 }
 0x587   :  { %v894_v35 = vadd.f32 %v890_v34, %v745_v48 }
 0x589   :  { %896 = vst.msk [vmem:[#allocation7] sm:$0xff] %vm100_vm0, %v894_v35 }
 0x58c   :  { %v891_v36 = vpop.f32.mrf.mxu1 }
 0x58d   :  { %v892_v63 = vadd.f32 %v1044_v32, %v891_v36 }
 0x58f   :  { %v895_v37 = vadd.f32 %v892_v63, %v1397_v52 }
 0x591   :  { %897 = vst.msk [vmem:[#allocation7 + $0x8] sm:$0xff] %vm100_vm0, %v895_v37 }
 0x592   :  { %910 = dma.vmem_to_hbm [thread:$0]  %s903_s17, 256, %s905_s9, [#allocation6], %s1152_s12, %s1152_s12, %s1148_s6  }
 0x593   :  { %1139 = dma.done.wait [#allocation6], 256  }
 0x594   :  { %1140 = vsyncadd [#allocation6], 4294967040 }
 0x595   :  { %915 = vsyncpa [#allocation5], 1 }
 0x596   :  { %916 = vsyncpa [#allocation6], 1 }

</bundles_post_ra>
